<compile_context>
chip_gen: v5e
topology: v5e:2x2
jax: 0.10.0
libtpu: 0.0.40
codegen_flags: <defaults>
</compile_context>

<pallas_src>
import functools

import jax
import jax.numpy as jnp
from jax.experimental import pallas as pl
from jax.experimental.pallas import tpu as pltpu


def _round_up(x, m):
    return ((x + m - 1) // m) * m


def _physical_vmem_bytes():
    """Best-effort physical VMEM query; conservative 64 MiB fallback."""
    default = 64 * 1024 * 1024
    try:
        info = pltpu.get_tpu_info()
    except Exception:
        return default
    for attr in ("vmem_capacity_bytes", "vmem_bytes", "vmem_size_bytes"):
        v = getattr(info, attr, None)
        if isinstance(v, int) and v > 0:
            return v
    return default


def _pick_tile(dim, unit, max_tile, prefer_multi=False):
    """Largest multiple of `unit` dividing `dim`, <= max_tile.
    If prefer_multi, prefer a tile giving >= 2 grid blocks when possible."""
    limit = min(dim, max_tile)
    cands = [t for t in range(unit, limit + 1, unit) if dim % t == 0]
    if not cands:
        return dim
    if prefer_multi:
        multi = [t for t in cands if dim // t >= 2]
        if multi:
            return max(multi)
    return max(cands)


def _block_spec(shape, index_map, buffer_count=None):
    """BlockSpec with optional explicit pipeline buffering (falls back if unsupported)."""
    if buffer_count is not None and hasattr(pl, "Buffered"):
        try:
            return pl.BlockSpec(shape, index_map, pipeline_mode=pl.Buffered(buffer_count))
        except TypeError:
            pass
    return pl.BlockSpec(shape, index_map)


def _fit_rows(x, rows):
    """Zero-pad or slice the leading (node) axis to `rows`."""
    r = x.shape[0]
    if r == rows:
        return x
    if r > rows:
        return x[:rows]
    return jnp.zeros((rows,) + x.shape[1:], x.dtype).at[:r].set(x)


def _matmul_kernel(a_ref, b_ref, bias_ref, out_ref, acc_ref, *, epilogue, valid_cols):
    """K-tiled  out = epilogue(A @ B + bias)  with f32 accumulator scratch."""
    k = pl.program_id(1)

    @pl.when(k == 0)
    def _init():
        acc_ref[...] = jnp.zeros_like(acc_ref)

    acc_ref[...] += jnp.dot(a_ref[...], b_ref[...], preferred_element_type=jnp.float32)

    @pl.when(k == pl.num_programs(1) - 1)
    def _finish():
        y = acc_ref[...] + bias_ref[...]
        if epilogue == "relu":
            out_ref[...] = jnp.maximum(y, 0.0).astype(out_ref.dtype)
        elif epilogue == "log_softmax":
            # Masked log_softmax over the real class columns only.
            col = jax.lax.broadcasted_iota(jnp.int32, y.shape, dimension=1)
            y = jnp.where(col < valid_cols, y, -1e30)
            m = jnp.max(y, axis=1, keepdims=True)
            shifted = y - m
            lse = jnp.log(jnp.sum(jnp.exp(shifted), axis=1, keepdims=True))
            out_ref[...] = (shifted - lse).astype(out_ref.dtype)
        else:
            out_ref[...] = y.astype(out_ref.dtype)


def _matmul(a, b, bias, *, epilogue, valid_cols, out_dtype, tm, tk_max, vmem_limit):
    """pallas_call wrapper: grid (rows/tm, K/tk), K innermost with accumulator."""
    m_pad, k_pad = a.shape
    k_pad2, n_pad = b.shape
    assert k_pad == k_pad2 and m_pad % tm == 0

    tk = _pick_tile(k_pad, 128, tk_max)
    grid = (m_pad // tm, k_pad // tk)
    a_buffers = 3 if grid[0] * grid[1] >= 3 else 2  # deeper buffering on the HBM-bound A stream

    kernel = functools.partial(_matmul_kernel, epilogue=epilogue, valid_cols=valid_cols)

    flops = 2 * m_pad * k_pad * n_pad
    bytes_accessed = (
        a.size * a.dtype.itemsize
        + grid[0] * b.size * b.dtype.itemsize        # B re-streamed per row block
        + bias.size * bias.dtype.itemsize
        + m_pad * n_pad * jnp.dtype(out_dtype).itemsize
    )

    return pl.pallas_call(
        kernel,
        out_shape=jax.ShapeDtypeStruct((m_pad, n_pad), out_dtype),
        grid_spec=pltpu.PrefetchScalarGridSpec(
            num_scalar_prefetch=0,
            grid=grid,
            in_specs=[
                _block_spec((tm, tk), lambda i, k: (i, k), buffer_count=a_buffers),  # A row/K block
                _block_spec((tk, n_pad), lambda i, k: (k, 0)),                       # B K block
                _block_spec((1, n_pad), lambda i, k: (0, 0), buffer_count=1),        # bias (invariant)
            ],
            out_specs=pl.BlockSpec((tm, n_pad), lambda i, k: (i, 0)),
            scratch_shapes=[pltpu.VMEM((tm, n_pad), jnp.float32)],
        ),
        compiler_params=pltpu.CompilerParams(
            dimension_semantics=("parallel", "arbitrary"),
            vmem_limit_bytes=vmem_limit,
        ),
        cost_estimate=pl.CostEstimate(
            flops=flops,
            transcendentals=(m_pad * n_pad if epilogue == "log_softmax" else 0),
            bytes_accessed=bytes_accessed,
        ),
    )(a, b, bias)


def build_normalized_adjacency(edge_index, num_nodes):
    """Dense A_hat = D^{-1/2}(A+I)D^{-1/2}, matching PyG GCNConv gcn_norm defaults.

    Duplicate edges sum; existing self loops are replaced by weight-1 self loops
    (add_remaining_self_loops semantics)."""
    src, dst = edge_index[0], edge_index[1]
    off_diag = (src != dst).astype(jnp.float32)
    adj = jnp.zeros((num_nodes, num_nodes), jnp.float32)
    # message flows source -> target: out[i] = sum_{(j,i) in E} norm_ij * (x[j] @ W)
    adj = adj.at[dst, src].add(off_diag)
    adj = adj + jnp.eye(num_nodes, dtype=jnp.float32)   # weight-1 self loops
    deg = jnp.sum(adj, axis=1)
    d_inv_sqrt = jnp.where(deg > 0, jax.lax.rsqrt(deg), 0.0)
    return adj * d_inv_sqrt[:, None] * d_inv_sqrt[None, :]


def gcn_forward(x, edge_index, w1, b1, w2, b2):
    """out = log_softmax(A_hat @ relu(A_hat @ X @ W1 + b1) @ W2 + b2, axis=1)."""
    n, f = x.shape
    h = w1.shape[1]
    c = w2.shape[1]

    # Per-generation tile caps / VMEM limit.
    phys_vmem = _physical_vmem_bytes()
    if phys_vmem <= 64 * 1024 * 1024:      # v7x-class (64 MiB per TC)
        tm_max, tk_max = 512, 1024
    else:                                   # v5e / v6e (128 MiB)
        tm_max, tk_max = 1024, 2048
    vmem_limit = min(64 * 1024 * 1024, int(phys_vmem * 0.7))

    # Lane-dense padding (last dims -> multiples of 128).
    f_pad = _round_up(f, 128)
    h_pad = _round_up(h, 128)
    c_pad = _round_up(c, 128)

    # A columns / feature rows: pad to 128 only (decoupled from tm, less HBM traffic).
    n_col_pad = _round_up(n, 128)
    # A rows / output rows: pad so there are always >= 2 row blocks (v7x has 2 TCs).
    if n <= 2 * tm_max:
        tm = _round_up(max(-(-n // 2), 8), 8)
        n_row_pad = 2 * tm
    else:
        tm = tm_max
        n_row_pad = _round_up(n, tm)

    a_hat = build_normalized_adjacency(edge_index, n)

    a_pad = jnp.zeros((n_row_pad, n_col_pad), jnp.float32).at[:n, :n].set(a_hat).astype(jnp.bfloat16)
    x_pad = jnp.zeros((n_col_pad, f_pad), jnp.float32).at[:n, :f].set(x).astype(jnp.bfloat16)
    w1_pad = jnp.zeros((f_pad, h_pad), jnp.float32).at[:f, :h].set(w1).astype(jnp.bfloat16)
    b1_pad = jnp.zeros((1, h_pad), jnp.float32).at[:, :h].set(b1.reshape(1, -1))
    w2_pad = jnp.zeros((h_pad, c_pad), jnp.float32).at[:h, :c].set(w2).astype(jnp.bfloat16)
    b2_pad = jnp.zeros((1, c_pad), jnp.float32).at[:, :c].set(b2.reshape(1, -1))
    zero_b1 = jnp.zeros((1, h_pad), jnp.float32)
    zero_b2 = jnp.zeros((1, c_pad), jnp.float32)

    # Row tile for the (small) projection matmuls: divisor of n_col_pad, >= 2 blocks if possible.
    tm_p = _pick_tile(n_col_pad, 8, tm_max, prefer_multi=True)

    # ---- Layer 1: proj1 = X @ W1 (hoisted, once); H = relu(A_hat @ proj1 + b1) ----
    proj1 = _matmul(x_pad, w1_pad, zero_b1, epilogue="none", valid_cols=h_pad,
                    out_dtype=jnp.bfloat16, tm=tm_p, tk_max=tk_max, vmem_limit=vmem_limit)
    h_act = _matmul(a_pad, proj1, b1_pad, epilogue="relu", valid_cols=h_pad,
                    out_dtype=jnp.bfloat16, tm=tm, tk_max=tk_max, vmem_limit=vmem_limit)

    # TODO(synk): F.dropout(p=0.5, training=True) path not implemented; module is
    # evaluated in eval mode where dropout is the identity.

    # ---- Layer 2: proj2 = H @ W2 (hoisted); out = log_softmax(A_hat @ proj2 + b2) ----
    h_fit = _fit_rows(h_act, n_col_pad)
    proj2 = _matmul(h_fit, w2_pad, zero_b2, epilogue="none", valid_cols=c_pad,
                    out_dtype=jnp.bfloat16, tm=tm_p, tk_max=tk_max, vmem_limit=vmem_limit)
    out = _matmul(a_pad, proj2, b2_pad, epilogue="log_softmax", valid_cols=c,
                  out_dtype=jnp.float32, tm=tm, tk_max=tk_max, vmem_limit=vmem_limit)

    return out[:n, :c]


def gcn_reference(x, edge_index, w1, b1, w2, b2):
    a_hat = build_normalized_adjacency(edge_index, x.shape[0])
    h = jnp.maximum(a_hat @ x @ w1 + b1, 0.0)
    logits = a_hat @ h @ w2 + b2
    return jax.nn.log_softmax(logits, axis=1)


def glorot(key, shape):
    fan_in, fan_out = shape
    limit = jnp.sqrt(6.0 / (fan_in + fan_out))
    return jax.random.uniform(key, shape, jnp.float32, -limit, limit)


if __name__ == "__main__":
    num_nodes = 8
    num_features = 4
    hidden_channels = 16
    num_classes = 4

    key = jax.random.PRNGKey(0)
    kx, kw1, kw2 = jax.random.split(key, 3)

    # deterministic node features
    x = jax.random.normal(kx, (num_nodes, num_features), jnp.float32)

    # simple deterministic undirected ring graph, stored as directed edges both ways
    src = jnp.arange(num_nodes, dtype=jnp.int32)
    dst = (src + 1) % num_nodes
    edge_index = jnp.stack(
        [jnp.concatenate([src, dst]), jnp.concatenate([dst, src])], axis=0
    )  # (2, 2*num_nodes)

    # deterministic GCNConv parameters (weights glorot-uniform, biases zero)
    w1 = glorot(kw1, (num_features, hidden_channels))
    b1 = jnp.zeros((1, hidden_channels), jnp.float32)
    w2 = glorot(kw2, (hidden_channels, num_classes))
    b2 = jnp.zeros((1, num_classes), jnp.float32)

    out = gcn_forward(x, edge_index, w1, b1, w2, b2)
    out = jax.block_until_ready(out)

    # sanity checks
    assert out.shape == (num_nodes, num_classes)
    row_prob_sums = jnp.sum(jnp.exp(out), axis=1)
    assert bool(jnp.all(jnp.abs(row_prob_sums - 1.0) < 1e-3))
    ref = gcn_reference(x, edge_index, w1, b1, w2, b2)
    assert bool(jnp.max(jnp.abs(out - ref)) < 0.1)   # bf16-matmul tolerance
    assert bool(jnp.all(jnp.isfinite(out)))

    print("KERNEL_OK")
</pallas_src>

<mosaic_0001>
module attributes {stable_mosaic.version = 11 : i64} {
  func.func @_matmul_kernel(%arg0: i32, %arg1: i32, %arg2: memref<64x128xbf16, #tpu.memory_space<vmem>>, %arg3: memref<128x128xbf16, #tpu.memory_space<vmem>>, %arg4: memref<1x128xf32, #tpu.memory_space<vmem>>, %arg5: memref<64x128xbf16, #tpu.memory_space<vmem>>, %arg6: memref<64x128xf32, #tpu.memory_space<vmem>>) attributes {dimension_semantics = [#tpu.dimension_semantics<parallel>, #tpu.dimension_semantics<arbitrary>], iteration_bounds = array<i64: 2, 1>, scalar_prefetch = 0 : i64, scratch_operands = 1 : i64, tpu.core_type = #tpu.core_type<tc>, window_params = [{pipeline_mode = #tpu.pipeline_mode<double_buffered>, transform_indices = @transform_0, window_bounds = array<i64: 64, 128>}, {transform_indices = @transform_1, window_bounds = array<i64: 128, 128>}, {pipeline_mode = #tpu.pipeline_mode<synchronous>, transform_indices = @transform_2, window_bounds = array<i64: 1, 128>}, {transform_indices = @transform_3, window_bounds = array<i64: 64, 128>}]} {
    %c0_i32 = arith.constant 0 : i32
    %0 = arith.cmpi eq, %arg1, %c0_i32 : i32
    %1 = arith.extui %0 : i1 to i32
    %c0_i32_0 = arith.constant 0 : i32
    %2 = arith.cmpi ne, %1, %c0_i32_0 : i32
    scf.if %2 {
      %cst_10 = arith.constant 0.000000e+00 : f32
      %12 = vector.broadcast %cst_10 : f32 to vector<64x128xf32>
      %c0_11 = arith.constant 0 : index
      %c0_12 = arith.constant 0 : index
      %13 = vector.load %arg6[%c0_11, %c0_12] : memref<64x128xf32, #tpu.memory_space<vmem>>, vector<64x128xf32>
      tpu.vector_store %arg6[%c0_11, %c0_12], %12 {strides = array<i32>} : memref<64x128xf32, #tpu.memory_space<vmem>>, vector<64x128xf32>,
    } else {
    }
    %c0 = arith.constant 0 : index
    %c0_1 = arith.constant 0 : index
    %3 = vector.load %arg6[%c0, %c0_1] : memref<64x128xf32, #tpu.memory_space<vmem>>, vector<64x128xf32>
    %c0_2 = arith.constant 0 : index
    %c0_3 = arith.constant 0 : index
    %4 = vector.load %arg2[%c0_2, %c0_3] : memref<64x128xbf16, #tpu.memory_space<vmem>>, vector<64x128xbf16>
    %c0_4 = arith.constant 0 : index
    %c0_5 = arith.constant 0 : index
    %5 = vector.load %arg3[%c0_4, %c0_5] : memref<128x128xbf16, #tpu.memory_space<vmem>>, vector<128x128xbf16>
    %cst = arith.constant dense<0.000000e+00> : vector<64x128xf32>
    %6 = tpu.matmul %4, %5, %cst {dimension_numbers = #tpu.dot_dimension_numbers<[1], [0], [0], [1], [0, 0, 1, 1], [], []>} : vector<64x128xbf16>, vector<128x128xbf16>, vector<64x128xf32> -> vector<64x128xf32>
    %7 = arith.addf %3, %6 : vector<64x128xf32>
    %c0_6 = arith.constant 0 : index
    %c0_7 = arith.constant 0 : index
    %8 = vector.load %arg6[%c0_6, %c0_7] : memref<64x128xf32, #tpu.memory_space<vmem>>, vector<64x128xf32>
    tpu.vector_store %arg6[%c0_6, %c0_7], %7 {strides = array<i32>} : memref<64x128xf32, #tpu.memory_space<vmem>>, vector<64x128xf32>,
    %c0_i32_8 = arith.constant 0 : i32
    %9 = arith.cmpi eq, %arg1, %c0_i32_8 : i32
    %10 = arith.extui %9 : i1 to i32
    %c0_i32_9 = arith.constant 0 : i32
    %11 = arith.cmpi ne, %10, %c0_i32_9 : i32
    scf.if %11 {
      %c0_10 = arith.constant 0 : index
      %c0_11 = arith.constant 0 : index
      %12 = vector.load %arg6[%c0_10, %c0_11] : memref<64x128xf32, #tpu.memory_space<vmem>>, vector<64x128xf32>
      %c0_12 = arith.constant 0 : index
      %c0_13 = arith.constant 0 : index
      %13 = vector.load %arg4[%c0_12, %c0_13] : memref<1x128xf32, #tpu.memory_space<vmem>>, vector<1x128xf32>
      %14 = vector.broadcast %13 : vector<1x128xf32> to vector<64x128xf32>
      %15 = arith.addf %12, %14 : vector<64x128xf32>
      %16 = arith.truncf %15 : vector<64x128xf32> to vector<64x128xbf16>
      %c0_14 = arith.constant 0 : index
      %c0_15 = arith.constant 0 : index
      %17 = vector.load %arg5[%c0_14, %c0_15] : memref<64x128xbf16, #tpu.memory_space<vmem>>, vector<64x128xbf16>
      tpu.vector_store %arg5[%c0_14, %c0_15], %16 {strides = array<i32>} : memref<64x128xbf16, #tpu.memory_space<vmem>>, vector<64x128xbf16>,
    } else {
    }
    return
  }
  func.func @transform_0(%arg0: i32, %arg1: i32) -> (i32, i32) {
    %c0_i32 = arith.constant 0 : i32
    return %arg0, %arg1 : i32, i32
  }
  func.func @transform_1(%arg0: i32, %arg1: i32) -> (i32, i32) {
    %c0_i32 = arith.constant 0 : i32
    %c0_i32_0 = arith.constant 0 : i32
    return %arg1, %c0_i32 : i32, i32
  }
  func.func @transform_2(%arg0: i32, %arg1: i32) -> (i32, i32) {
    %c0_i32 = arith.constant 0 : i32
    %c0_i32_0 = arith.constant 0 : i32
    %c0_i32_1 = arith.constant 0 : i32
    return %c0_i32, %c0_i32_0 : i32, i32
  }
  func.func @transform_3(%arg0: i32, %arg1: i32) -> (i32, i32) {
    %c0_i32 = arith.constant 0 : i32
    %c0_i32_0 = arith.constant 0 : i32
    return %arg0, %c0_i32 : i32, i32
  }
}

</mosaic_0001>

<bundles_post_ra>
// kernel: tpu_custom_call.1
= control target key start
LH: loop header
LB: loop body
LE: loop exit
PB: predicated region body
PF: predicated region fallthrough
CT: control target
= control target key end

     0   :  { %s1090_s0 = inlined_call_operand.hbm [shape: bf16[128,128], index: 0, kind: input, shape index: {}]   ;;  %s1091_s1 = inlined_call_operand.hbm [shape: bf16[128,128], index: 1, kind: input, shape index: {}]   ;;  %s1092_s2 = inlined_call_operand.vmem [shape: f32[1,128], index: 2, kind: input, shape index: {}]   ;;  %s1093_s3 = inlined_call_operand.hbm [shape: bf16[128,128], index: 3, kind: output, shape index: {}]  }
   0x1   :  { %1095 = sst [smem:[#allocation12_spill]] %s1091_s1 }
   0x2   :  { %8 = vsyncpa [#allocation4], 0 }
   0x3   :  { %10 = vsyncpa [#allocation4 + $0x1], 0 }
   0x4   :  { %11 = vsyncpa [#allocation7], 0 }
   0x5   :  { %12 = vsyncpa [#allocation5], 0 }
   0x6   :  { %14 = vsyncpa [#allocation5 + $0x1], 0  ;;  %s922_s12 = smov 0   ;;  %s924_s13 = smov 0  }
   0x7   :  { %s926_s14 = smov 0   ;;  %s928_s15 = smov 0  }
   0x8   :  { %s930_s16 = smov 0   ;;  %s932_s17 = smov 0  }
   0x9 LB: > { %s545_s18 = sadd.s32 4294967295, %s895_s17   ;;  %s546_s19 = sadd.s32 4294967294, %s895_s17   ;;  %s895_s17 = sphi %s932_s17, %s20_s17   ;;  %s891_s16 = sphi %s930_s16, %s1109_s16   ;;  %s887_s15 = sphi %s928_s15, %s1108_s15   ;;  %s883_s14 = sphi %s926_s14, %s1107_s14   ;;  %s879_s13 = sphi %s924_s13, %s1106_s13   ;;  %s875_s12 = sphi %s922_s12, %s1105_s12  }
   0xa   : > { %p54_p0 = scmp.ne.s32.totalorder %s879_s13, %s875_s12  ;;  %p956_p1 = scmp.eq.s32.totalorder %s545_s18, 0 }
   0xb   : > { %p960_p2 = scmp.eq.s32.totalorder %s545_s18, 1  ;;  %p131_p3 = scmp.eq.s32.totalorder %s546_s19, 1 }
   0xc   : > { %p966_p4 = por %p956_p1, %p54_p0  ;;  %p547_p5 = scmp.ge.s32.totalorder %s895_s17, 1 }
   0xd   : > { %p971_p6 = por %p131_p3, %p54_p0  ;;  %p138_p7 = scmp.lt.s32.totalorder %s895_s17, 3 }
   0xe   : > { %s1100_s1 = sld [smem:[#allocation12_spill]]  ;;  %s897_s28 = smov [#allocation6]  }
   0xf   : > { %p979_p8 = pnand %p547_p5, %p138_p7  ;;  %s154_s29 = sshll.u32 %s897_s28, 4  ;;  %s155_s29 = int_to_ptr.vmem [resolvable:$true] %s154_s29 }
  0x10   : > { %p549_p11 = scmp.ge.s32.totalorder %s895_s17, 2  ;;  %s1094_s30 = smov 64  }
  0x11   : > { %p679_p9 = pneg %p979_p8  ;;  %s899_s4 = smov 4  }
  0x12   : > { %s32_s5 = sadd.s32 1, %s891_s16  ;;  %s41_s6 = sadd.s32 1, %s883_s14 }
  0x13   : > { %p680_p10 = pnand %p679_p9, %p956_p1  ;;  %p34_p12 = scmp.ge.s32.totalorder %s32_s5, 2 }
  0x14   : > { %s152_s26 = sshll.u32 %s1100_s1, 4  ;;  %p48_p13 = scmp.ne.s32.totalorder %s883_s14, %s879_s13  ;;  %s153_s26 = int_to_ptr.hbm [resolvable:$true] %s152_s26 }
  0x15   : > { %682 = dma.hbm_to_vmem [thread:$0]  (!%p680_p10), %s153_s26, 1024, %s155_s29, [#allocation7], %s1094_s30, %s1094_s30, %s899_s4  }
  0x16   : > { %p49_p0 = scmp.eq.s32.totalorder %s895_s17, 0  ;;  %s1111_s5 = smov (%p34_p12, %s32_s5), 0 }
  0x17   : > { %p1004_p5 = por %p960_p2, %p48_p13  ;;  %s36_s9 = ssub.s32 %s891_s16, %s1111_s5 }
  0x18   : > { %p998_p3 = por %p49_p0, %p48_p13  ;;  %p692_p7 = scmp.lt.s32.totalorder %s895_s17, 2 }
  0x19   : > { %p39_p9 = scmp.eq.s32.totalorder %s36_s9, 0  ;;  %s171_s10 = sand.u32 1, %s883_s14  }
  0x1a   : > { %s550_s11 = sshll.u32 %s171_s10, 5  ;;  %s610_s19 = sshll.u32 %s891_s16, 5 }
  0x1b   : > { %s1013_s18 = scalar_select %p39_p9, %s883_s14, %s41_s6  }
  0x1c   : > { %s181_s26 = scalar_lea.hbm %s1090_s0, %s610_s19  ;;  %s175_s28 = scalar_lea.vmem [#allocation3], %s550_s11 }
  0x1d   : > { %s184_s29 = sshll.u32 %s175_s28, 4  ;;  %s182_s21 = sshll.u32 %s181_s26, 4  ;;  %s185_s29 = int_to_ptr.vmem [resolvable:$true] %s184_s29  ;;  %s183_s21 = int_to_ptr.hbm [resolvable:$true] %s182_s21 }
  0x1e   : > { %p684_p2 = pnand %p692_p7, %p998_p3  ;;  %s172_s30 = scalar_lea.sflag [#allocation4], %s171_s10 }
  0x1f   : > { %s1104_s1 = smov 64   ;;  %196 = sbr.rel (%p979_p8) target bundleno = 221 (0xdd), region = 32 }
  0x20   : > { %686 = dma.hbm_to_vmem [thread:$0]  (!%p684_p2), %s183_s21, 512, %s185_s29, %s172_s30, %s1104_s1, %s1104_s1, %s899_s4  }
  0x21   : > { %s1027_s6 = sand.u32 (!%p979_p8), 1, %s879_s13  }
  0x22   : > { %s554_s9 = sshll.u32 (!%p979_p8), %s1027_s6, 5  ;;  %s199_s11 = scalar_lea.sflag (!%p979_p8), [#allocation4], %s1027_s6 }
  0x23   : > { %s1033_s7 = scalar_lea.vmem (!%p979_p8), [#allocation3], %s554_s9 }
  0x24   : > { %862 = dma.done.wait (%p966_p4), %s199_s11, 512  }
  0x25   : > { %864 = vsyncadd (%p966_p4), %s199_s11, 4294966784 }
  0x26   : > { %866 = dma.done.wait (%p956_p1), [#allocation7], 1024  }
  0x27   : > { %868 = vsyncadd (%p956_p1), [#allocation7], 4294966272  ;;  %v622_v0 = vld [vmem:[#allocation6 + $0x38] sm:$0xff]  ;;  %v621_v1 = vld [vmem:[#allocation6 + $0x30] sm:$0xff]  ;;  %s623_s22 = sshll.u32 %s887_s15, 5  ;;  %s230_s10 = scalar_lea.vmem [#allocation8], %s554_s9 }
  0x28   : > { %350 = vmatpush.bf16.msra.mxu0 %v622_v0  ;;  %647 = vmatpush.bf16.msra.mxu1 %v622_v0  ;;  %v620_v2 = vld [vmem:[#allocation6 + $0x28] sm:$0xff]  ;;  %v619_v3 = vld [vmem:[#allocation6 + $0x20] sm:$0xff]  ;;  %v618_v4 = vld [vmem:[#allocation6 + $0x18] sm:$0xff]  ;;  %s446_s4 = scalar_lea.hbm %s1093_s3, %s623_s22  ;;  %s447_s19 = sshll.u32 %s230_s10, 4  ;;  %s448_s19 = int_to_ptr.vmem [resolvable:$true] %s447_s19 }
  0x29   : > { %648 = vmatpush.bf16.msra.mxu2 %v622_v0  ;;  %649 = vmatpush.bf16.msra.mxu3 %v622_v0  ;;  %v617_v5 = vld [vmem:[#allocation6 + $0x10] sm:$0xff]  ;;  %v616_v6 = vld [vmem:[#allocation6 + $0x8] sm:$0xff]  ;;  %v615_v7 = vld [vmem:[#allocation6] sm:$0xff]  ;;  %s449_s24 = sshll.u32 %s446_s4, 4  ;;  %s435_s15 = scalar_lea.sflag [#allocation5], %s1027_s6  ;;  %s450_s24 = int_to_ptr.hbm [resolvable:$true] %s449_s24 }
  0x2a   : > { %v611_v8 = vld [vmem:[%s1033_s7] sm:$0xff]  ;;  %v612_v9 = vld [vmem:[%s1033_s7 + $0x8] sm:$0xff]  ;;  %v613_v10 = vld [vmem:[%s1033_s7 + $0x10] sm:$0xff]  ;;  %s823_s25 = sshra.s32 %s450_s24, 4  ;;  %s829_s21 = scalar_lea.hbm %s1093_s3, 64  ;;  %s824_s25 = int_to_ptr.hbm [resolvable:$true] %s823_s25 }
  0x2b   : > { %v614_v11 = vld [vmem:[%s1033_s7 + $0x18] sm:$0xff]  ;;  %v748_v14 = vld [vmem:[%s1092_s2] ss:$0 sm:$0xff]  ;;  %s825_s26 = scalar_lea.hbm %s824_s25, 32  ;;  %p830_p10 = scmp.lt.s32.totalorder %s824_s25, %s1093_s3 }
  0x2c   : > { %351 = vmatpush.bf16.msra.mxu0 %v621_v1  ;;  %650 = vmatpush.bf16.msra.mxu1 %v621_v1  ;;  %p826_p1 = scmp.ne.s32.totalorder %s824_s25, %s825_s26  ;;  %p831_p12 = scmp.lt.s32.totalorder %s829_s21, %s825_s26 }
  0x2d   : > { %651 = vmatpush.bf16.msra.mxu2 %v621_v1  ;;  %652 = vmatpush.bf16.msra.mxu3 %v621_v1 }
  0x2e   : > { %p827_p4 = pnand %p826_p1, %p1004_p5  ;;  %p832_p13 = por %p831_p12, %p830_p10 }
  0x30   : > { %352 = vmatpush.bf16.msra.mxu0 %v620_v2  ;;  %653 = vmatpush.bf16.msra.mxu1 %v620_v2  ;;  %p828_p8 = pneg %p827_p4 }
  0x31   : > { %654 = vmatpush.bf16.msra.mxu2 %v620_v2  ;;  %655 = vmatpush.bf16.msra.mxu3 %v620_v2 }
  0x32   : > { %p833_p0 = pnand %p832_p13, %p828_p8 }
  0x34   : > { %353 = vmatpush.bf16.msra.mxu0 %v619_v3  ;;  %656 = vmatpush.bf16.msra.mxu1 %v619_v3 }
  0x35   : > { %657 = vmatpush.bf16.msra.mxu2 %v619_v3  ;;  %658 = vmatpush.bf16.msra.mxu3 %v619_v3 }
  0x38   : > { %354 = vmatpush.bf16.msra.mxu0 %v618_v4  ;;  %659 = vmatpush.bf16.msra.mxu1 %v618_v4 }
  0x39   : > { %660 = vmatpush.bf16.msra.mxu2 %v618_v4  ;;  %661 = vmatpush.bf16.msra.mxu3 %v618_v4 }
  0x3c   : > { %355 = vmatpush.bf16.msra.mxu0 %v617_v5  ;;  %662 = vmatpush.bf16.msra.mxu1 %v617_v5 }
  0x3d   : > { %663 = vmatpush.bf16.msra.mxu2 %v617_v5  ;;  %664 = vmatpush.bf16.msra.mxu3 %v617_v5 }
  0x40   : > { %356 = vmatpush.bf16.msra.mxu0 %v616_v6  ;;  %665 = vmatpush.bf16.msra.mxu1 %v616_v6 }
  0x41   : > { %666 = vmatpush.bf16.msra.mxu2 %v616_v6  ;;  %667 = vmatpush.bf16.msra.mxu3 %v616_v6 }
  0x44   : > { %357 = vmatpush.bf16.msra.mxu0 %v615_v7  ;;  %668 = vmatpush.bf16.msra.mxu1 %v615_v7 }
  0x45   : > { %669 = vmatpush.bf16.msra.mxu2 %v615_v7  ;;  %670 = vmatpush.bf16.msra.mxu3 %v615_v7 }
  0x47   : > { %358 = vmatmul.bf16.vlgmr.msra.gmra.mxu0 %v611_v8  ;;  %363 = vmatmul.bf16.vlgmr.msra.gmra.mxu1 %v612_v9 }
  0x48   : > { %368 = vmatmul.bf16.vlgmr.msra.gmra.mxu2 %v613_v10  ;;  %373 = vmatmul.bf16.vlgmr.msra.gmra.mxu3 %v614_v11 }
  0xc4   : > { %v359_v12 = vpop.f32.mrf.mxu0  ;;  %v364_v13 = vpop.f32.mrf.mxu1 }
  0xc5   : > { %v410_v19 = vadd.f32 %v748_v14, %v359_v12  ;;  %v412_v20 = vadd.f32 %v748_v14, %v364_v13 }
  0xcb   : > { %v369_v15 = vpop.f32.mrf.mxu2  ;;  %v374_v16 = vpop.f32.mrf.mxu3 }
  0xcc   : > { %v361_v17 = vpop.f32.mrf.mxu0  ;;  %v366_v18 = vpop.f32.mrf.mxu1  ;;  %v414_v27 = vadd.f32 %v748_v14, %v369_v15  ;;  %v416_v28 = vadd.f32 %v748_v14, %v374_v16 }
  0xcd   : > { %v411_v21 = vadd.f32 %v748_v14, %v361_v17  ;;  %v413_v22 = vadd.f32 %v748_v14, %v366_v18 }
  0xcf   : > { %v627_v23 = vpack.c.bf16 %v411_v21, %v410_v19  ;;  %v632_v24 = vpack.c.bf16 %v413_v22, %v412_v20 }
  0xd1   : > { %628 = vst [vmem:[%s230_s10] sm:$0xff] %v627_v23  }
  0xd2   : > { %644 = vst [vmem:[%s230_s10 + $0x8] sm:$0xff] %v632_v24  }
  0xd3   : > { %v371_v25 = vpop.f32.mrf.mxu2  ;;  %v376_v26 = vpop.f32.mrf.mxu3 }
  0xd4   : > { %v415_v29 = vadd.f32 %v748_v14, %v371_v25  ;;  %v417_v30 = vadd.f32 %v748_v14, %v376_v26 }
  0xd6   : > { %v637_v31 = vpack.c.bf16 %v415_v29, %v414_v27  ;;  %v642_v32 = vpack.c.bf16 %v417_v30, %v416_v28 }
  0xd8   : > { %645 = vst [vmem:[%s230_s10 + $0x10] sm:$0xff] %v637_v31  }
  0xd9   : > { %646 = vst [vmem:[%s230_s10 + $0x18] sm:$0xff] %v642_v32  }
  0xda   : > { %836 = shalt.err (!%p833_p0)
}
  0xdb   : > { %s900_s6 = smov 64   ;;  %s901_s7 = smov 4  }
  0xdc   : > { %677 = dma.vmem_to_hbm [thread:$0]  (%p1004_p5), %s448_s19, 512, %s450_s24, %s435_s15, %s900_s6, %s900_s6, %s901_s7  }
  0xdd PF: > { %s464_s1 = sand.u32 1, %s875_s12   ;;  %p688_p3 = pnand %p549_p11, %p971_p6 }
  0xde   : > { %s465_s20 = scalar_lea.sflag [#allocation5], %s464_s1 }
  0xdf   : > { %p689_p7 = pneg %p688_p3 }
  0xe1   : > { %870 = dma.done.wait (%p689_p7), %s465_s20, 512  }
  0xe2   : > { %872 = vsyncadd (%p689_p7), %s465_s20, 4294966784  ;;  %s20_s17 = sadd.s32 1, %s895_s17   ;;  %s1105_s12 = smov %s879_s13 }
  0xe3   : > { %p17_p9 = scmp.ge.s32.totalorder %s20_s17, 4   ;;  %s1106_s13 = smov %s883_s14 }
  0xe4   : > { %s1107_s14 = smov %s1013_s18  ;;  %s1108_s15 = smov %s891_s16 }
  0xe5   : > { %s1109_s16 = smov %s1111_s5  ;;  %19 = sbr.rel (!%p17_p9) target bundleno = 9 (0x9), region = 90 }
  0xea   :  { %471 = vsyncpa [#allocation4], 1 }
  0xeb   :  { %473 = vsyncpa [#allocation4 + $0x1], 1 }
  0xec   :  { %474 = vsyncpa [#allocation7], 1 }
  0xed   :  { %475 = vsyncpa [#allocation5], 1 }
  0xee   :  { %477 = vsyncpa [#allocation5 + $0x1], 1 }

</bundles_post_ra>
